<compile_context>
chip_gen: v6e
topology: v6e:2x2x1
jax: 0.10.0
libtpu: 0.0.40
codegen_flags: <defaults>
</compile_context>

<pallas_src>
import math
import functools

import jax
import jax.numpy as jnp
from jax import lax
from jax.experimental import pallas as pl
from jax.experimental.pallas import tpu as pltpu

CFG = dict(N_FEATURES=8, Z_DIM=16, N_CHANNELS=3, IM_SIZE=16)
KERNEL_SIZE = 4
BN_EPS = 1e-5

# Max batch tile: matches the v6e/v7x 2x256 MXU M width (use 128 on v5e if
# tuning per-chip; correctness is identical).
B_TILE_MAX = 256


def _round_up(x, m):
    return ((x + m - 1) // m) * m


# --------------------------------------------------------------------------
# Pallas kernel: entire generator as a chain of fused
# (matmul -> +shift -> activation) steps on one batch tile.
# --------------------------------------------------------------------------
def _make_generator_kernel(n_layers, acts):
    def kernel(*refs):
        # refs = (z, w_0, b_0, ..., w_{L-1}, b_{L-1}, out)
        o_ref = refs[-1]
        x = refs[0][...]                            # (B_TILE, D_in) bf16 (pre-cast)
        y = None
        for i in range(n_layers):
            w_ref = refs[1 + 2 * i]                 # (D_in, D_out) bf16, VMEM-resident
            b_ref = refs[2 + 2 * i]                 # (1, D_out)    f32
            y = jnp.dot(x, w_ref[...], preferred_element_type=jnp.float32)
            y = y + b_ref[...]                      # f32 affine (BN shift / bias) -> VPU
            if acts[i] == "relu":
                y = jnp.maximum(y, 0.0)
            else:                                   # "tanh" (final layer) -> EUP
                y = jnp.tanh(y)
            x = y.astype(jnp.bfloat16)              # feed next GEMM in bf16
        o_ref[...] = y.astype(o_ref.dtype)

    return kernel


def generator_pallas(z_flat, ws, bs, acts, b_tile):
    """z_flat: (B_pad, nz) bf16; ws[i]: (Din_i, Dout_i) bf16; bs[i]: (1, Dout_i) f32."""
    b_pad, nz = z_flat.shape
    d_out = ws[-1].shape[1]
    n_tiles = b_pad // b_tile

    args = [z_flat]
    # z is tiled along the batch grid; weights/biases use a constant index_map
    # so Pallas fetches them once and keeps them resident (no per-step re-DMA).
    in_specs = [pl.BlockSpec((b_tile, nz), lambda i: (i, 0))]
    for w, b in zip(ws, bs):
        args.append(w)
        args.append(b)
        in_specs.append(pl.BlockSpec(w.shape, lambda i: (0, 0)))
        in_specs.append(pl.BlockSpec(b.shape, lambda i: (0, 0)))

    flops = 2 * b_pad * sum(int(w.shape[0]) * int(w.shape[1]) for w in ws)
    bytes_accessed = (
        sum(int(w.size) * 2 for w in ws)        # bf16 weights
        + sum(int(b.size) * 4 for b in bs)      # f32 shifts
        + int(z_flat.size) * 2                  # bf16 z
        + b_pad * d_out * 4                     # f32 output
    )
    transcendentals = b_pad * d_out             # final tanh

    # TODO(synk): for repeated tiny-batch serving, keep the weights VMEM-resident
    # across calls (cross-pallas_call future pattern) instead of re-DMAing ~1 MiB
    # per invocation.
    return pl.pallas_call(
        _make_generator_kernel(len(ws), acts),
        out_shape=jax.ShapeDtypeStruct((b_pad, d_out), jnp.float32),
        grid=(n_tiles,),
        in_specs=in_specs,
        out_specs=pl.BlockSpec((b_tile, d_out), lambda i: (i, 0)),
        compiler_params=pltpu.CompilerParams(
            dimension_semantics=("parallel",)),     # v7x: shard batch tiles over 2 TCs
        cost_estimate=pl.CostEstimate(
            flops=flops,
            transcendentals=transcendentals,
            bytes_accessed=bytes_accessed),
    )(*args)


# --------------------------------------------------------------------------
# Init-time constant folding: ConvTranspose2d -> dense matrix (+ BN/bias fold)
# --------------------------------------------------------------------------
def _conv_transpose_ref(x_nhwc, w, stride, padding):
    """PyTorch ConvTranspose2d semantics (init-time / reference only).

    x_nhwc: (N, H, W, Cin); w: (Cin, Cout, kh, kw) (PyTorch layout)."""
    k = w.shape[2]
    w_hwio = w[:, :, ::-1, ::-1].transpose(2, 3, 0, 1)   # flip + (kh, kw, Cin, Cout)
    pad = k - 1 - padding
    return lax.conv_general_dilated(
        x_nhwc, w_hwio,
        window_strides=(1, 1),
        padding=[(pad, pad), (pad, pad)],
        lhs_dilation=(stride, stride),
        dimension_numbers=("NHWC", "HWIO", "NHWC"),
    )


def _dense_from_conv_transpose(w, h, wd, cin, stride, padding, out_layout):
    """Unroll a ConvTranspose2d into the dense matrix mapping the flattened
    NHWC input (h*wd*cin,) to the flattened output.  Runs ONCE at init."""
    d_in = h * wd * cin
    basis = jnp.eye(d_in, dtype=jnp.float32).reshape(d_in, h, wd, cin)
    out = _conv_transpose_ref(basis, w, stride, padding)      # (d_in, Ho, Wo, Cout)
    if out_layout == "NCHW":                                   # final layer only
        out = out.transpose(0, 3, 1, 2)
    return out.reshape(d_in, -1)


def init_generator_params(key):
    nf = CFG["N_FEATURES"]
    nz = CFG["Z_DIM"]
    nc = CFG["N_CHANNELS"]
    im = CFG["IM_SIZE"]
    nb = int(math.log2(im) - 3)
    k = KERNEL_SIZE

    layer_defs = [(nz, nf * 2 ** nb, 1, 0, False)]
    for i in range(nb):
        layer_defs.append((nf * 2 ** (nb - i), nf * 2 ** (nb - i - 1), 2, 1, False))
    layer_defs.append((nf, nc, 2, 1, True))

    ws, bs, acts, ref_layers = [], [], [], []
    h = w_sp = 1
    for li, (cin, cout, stride, pad, has_bias) in enumerate(layer_defs):
        key, wk, bk = jax.random.split(key, 3)
        w_conv = 0.02 * jax.random.normal(wk, (cin, cout, k, k), jnp.float32)
        ho = (h - 1) * stride - 2 * pad + k
        wo = (w_sp - 1) * stride - 2 * pad + k
        last = li == len(layer_defs) - 1
        out_layout = "NCHW" if last else "NHWC"
        # TODO(synk): dense unrolling only scales to small IM_SIZE (16 here); a
        # larger generator would need a phase-decomposed / K-tiled conv-transpose
        # kernel (v7x's 64 MiB VMEM hits the ceiling first).
        w_dense = _dense_from_conv_transpose(w_conv, h, w_sp, cin, stride, pad, out_layout)

        if has_bias:
            bias = 0.02 * jax.random.normal(bk, (cout,), jnp.float32)
            ch_scale = jnp.ones((cout,), jnp.float32)
            ch_shift = bias
            act = "tanh"
        else:
            # TODO(synk): BatchNorm2d implemented in eval mode (running_mean=0,
            # running_var=1, gamma=1, beta=0), not training-mode batch statistics.
            gamma = jnp.ones((cout,), jnp.float32)
            beta = jnp.zeros((cout,), jnp.float32)
            ch_scale = gamma / jnp.sqrt(1.0 + BN_EPS)
            ch_shift = beta
            act = "relu"

        if out_layout == "NCHW":            # columns flattened as (c, h, w)
            scale_cols = jnp.repeat(ch_scale, ho * wo)
            shift_cols = jnp.repeat(ch_shift, ho * wo)
        else:                               # columns flattened as (h, w, c)
            scale_cols = jnp.tile(ch_scale, ho * wo)
            shift_cols = jnp.tile(ch_shift, ho * wo)

        # Fold BN scale into the weight columns (one-time); bf16 = MXU-native.
        ws.append((w_dense * scale_cols[None, :]).astype(jnp.bfloat16))
        bs.append(shift_cols.reshape(1, -1).astype(jnp.float32))
        acts.append(act)
        ref_layers.append((w_conv, stride, pad, ch_scale, ch_shift, act))
        h, w_sp = ho, wo

    return tuple(ws), tuple(bs), tuple(acts), ref_layers


# --------------------------------------------------------------------------
# Forward (single pallas_call) and a pure-JAX reference for verification
# --------------------------------------------------------------------------
@functools.partial(jax.jit, static_argnums=(3,))
def generator_forward(z_nchw, ws, bs, acts):
    B = z_nchw.shape[0]
    # (B, nz, 1, 1) -> (B, nz), pre-cast to bf16 (halves z DMA, MXU-native LHS).
    z = z_nchw.reshape(B, -1).astype(jnp.bfloat16)

    # Pad batch to a sublane/MXU-friendly tile (>=16 for packed bf16 sublanes);
    # cap the tile at B_TILE_MAX and grid over batch for large B.
    b_pad = _round_up(B, 16)
    if b_pad > B_TILE_MAX:
        b_tile = B_TILE_MAX
        b_pad = _round_up(B, B_TILE_MAX)
    else:
        b_tile = b_pad
    if b_pad != B:
        z = jnp.pad(z, ((0, b_pad - B), (0, 0)))

    out_flat = generator_pallas(z, ws, bs, acts, b_tile)    # (B_pad, nc*im*im), (c,h,w) cols
    nc, im = CFG["N_CHANNELS"], CFG["IM_SIZE"]
    return out_flat[:B].reshape(B, nc, im, im)              # NCHW, slice + reshape only


def _reference_forward(z_nchw, ref_layers):
    x = jnp.transpose(z_nchw, (0, 2, 3, 1))                 # NHWC
    for (w_conv, stride, pad, ch_scale, ch_shift, act) in ref_layers:
        x = _conv_transpose_ref(x, w_conv, stride, pad)
        x = x * ch_scale + ch_shift
        x = jnp.maximum(x, 0.0) if act == "relu" else jnp.tanh(x)
    return jnp.transpose(x, (0, 3, 1, 2))                   # NCHW


if __name__ == "__main__":
    key = jax.random.PRNGKey(0)
    kp, kz = jax.random.split(key)
    ws, bs, acts, ref_layers = init_generator_params(kp)

    B = 2
    z = jax.random.normal(kz, (B, CFG["Z_DIM"], 1, 1), jnp.float32)

    out = generator_forward(z, ws, bs, acts)
    out = jax.block_until_ready(out)

    assert out.shape == (B, CFG["N_CHANNELS"], CFG["IM_SIZE"], CFG["IM_SIZE"]), out.shape
    assert bool(jnp.all(jnp.isfinite(out)))
    assert bool(jnp.all(jnp.abs(out) <= 1.0 + 1e-6))        # tanh range

    ref = _reference_forward(z, ref_layers)                  # f32 reference
    assert bool(jnp.allclose(out, ref, atol=1e-2, rtol=0)), float(jnp.max(jnp.abs(out - ref)))

    print("KERNEL_OK")
</pallas_src>

<mosaic_0001>
module attributes {stable_mosaic.version = 11 : i64} {
  func.func @kernel(%arg0: i32, %arg1: memref<16x16xbf16, #tpu.memory_space<vmem>>, %arg2: memref<16x256xbf16, #tpu.memory_space<vmem>>, %arg3: memref<1x256xf32, #tpu.memory_space<vmem>>, %arg4: memref<256x512xbf16, #tpu.memory_space<vmem>>, %arg5: memref<1x512xf32, #tpu.memory_space<vmem>>, %arg6: memref<512x768xbf16, #tpu.memory_space<vmem>>, %arg7: memref<1x768xf32, #tpu.memory_space<vmem>>, %arg8: memref<16x768xf32, #tpu.memory_space<vmem>>) attributes {dimension_semantics = [#tpu.dimension_semantics<parallel>], iteration_bounds = array<i64: 1>, scalar_prefetch = 0 : i64, scratch_operands = 0 : i64, tpu.core_type = #tpu.core_type<tc>, window_params = [{transform_indices = @transform_0, window_bounds = array<i64: 16, 16>}, {pipeline_mode = #tpu.pipeline_mode<synchronous>, transform_indices = @transform_1, window_bounds = array<i64: 16, 256>}, {pipeline_mode = #tpu.pipeline_mode<synchronous>, transform_indices = @transform_2, window_bounds = array<i64: 1, 256>}, {pipeline_mode = #tpu.pipeline_mode<synchronous>, transform_indices = @transform_3, window_bounds = array<i64: 256, 512>}, {pipeline_mode = #tpu.pipeline_mode<synchronous>, transform_indices = @transform_4, window_bounds = array<i64: 1, 512>}, {pipeline_mode = #tpu.pipeline_mode<synchronous>, transform_indices = @transform_5, window_bounds = array<i64: 512, 768>}, {pipeline_mode = #tpu.pipeline_mode<synchronous>, transform_indices = @transform_6, window_bounds = array<i64: 1, 768>}, {transform_indices = @transform_7, window_bounds = array<i64: 16, 768>}]} {
    %c0 = arith.constant 0 : index
    %c0_0 = arith.constant 0 : index
    %0 = vector.load %arg1[%c0, %c0_0] : memref<16x16xbf16, #tpu.memory_space<vmem>>, vector<16x16xbf16>
    %c0_1 = arith.constant 0 : index
    %c0_2 = arith.constant 0 : index
    %1 = vector.load %arg2[%c0_1, %c0_2] : memref<16x256xbf16, #tpu.memory_space<vmem>>, vector<16x256xbf16>
    %cst = arith.constant dense<0.000000e+00> : vector<16x256xf32>
    %2 = tpu.matmul %0, %1, %cst {dimension_numbers = #tpu.dot_dimension_numbers<[1], [0], [0], [1], [0, 0, 1, 1], [], []>} : vector<16x16xbf16>, vector<16x256xbf16>, vector<16x256xf32> -> vector<16x256xf32>
    %c0_3 = arith.constant 0 : index
    %c0_4 = arith.constant 0 : index
    %3 = vector.load %arg3[%c0_3, %c0_4] : memref<1x256xf32, #tpu.memory_space<vmem>>, vector<1x256xf32>
    %4 = vector.broadcast %3 : vector<1x256xf32> to vector<16x256xf32>
    %5 = arith.addf %2, %4 : vector<16x256xf32>
    %cst_5 = arith.constant 0.000000e+00 : f32
    %6 = vector.broadcast %cst_5 : f32 to vector<16x256xf32>
    %7 = arith.maximumf %5, %6 : vector<16x256xf32>
    %8 = arith.truncf %7 : vector<16x256xf32> to vector<16x256xbf16>
    %c0_6 = arith.constant 0 : index
    %c0_7 = arith.constant 0 : index
    %9 = vector.load %arg4[%c0_6, %c0_7] : memref<256x512xbf16, #tpu.memory_space<vmem>>, vector<256x512xbf16>
    %cst_8 = arith.constant dense<0.000000e+00> : vector<16x512xf32>
    %10 = tpu.matmul %8, %9, %cst_8 {dimension_numbers = #tpu.dot_dimension_numbers<[1], [0], [0], [1], [0, 0, 1, 1], [], []>} : vector<16x256xbf16>, vector<256x512xbf16>, vector<16x512xf32> -> vector<16x512xf32>
    %c0_9 = arith.constant 0 : index
    %c0_10 = arith.constant 0 : index
    %11 = vector.load %arg5[%c0_9, %c0_10] : memref<1x512xf32, #tpu.memory_space<vmem>>, vector<1x512xf32>
    %12 = vector.broadcast %11 : vector<1x512xf32> to vector<16x512xf32>
    %13 = arith.addf %10, %12 : vector<16x512xf32>
    %cst_11 = arith.constant 0.000000e+00 : f32
    %14 = vector.broadcast %cst_11 : f32 to vector<16x512xf32>
    %15 = arith.maximumf %13, %14 : vector<16x512xf32>
    %16 = arith.truncf %15 : vector<16x512xf32> to vector<16x512xbf16>
    %c0_12 = arith.constant 0 : index
    %c0_13 = arith.constant 0 : index
    %17 = vector.load %arg6[%c0_12, %c0_13] : memref<512x768xbf16, #tpu.memory_space<vmem>>, vector<512x768xbf16>
    %cst_14 = arith.constant dense<0.000000e+00> : vector<16x768xf32>
    %18 = tpu.matmul %16, %17, %cst_14 {dimension_numbers = #tpu.dot_dimension_numbers<[1], [0], [0], [1], [0, 0, 1, 1], [], []>} : vector<16x512xbf16>, vector<512x768xbf16>, vector<16x768xf32> -> vector<16x768xf32>
    %c0_15 = arith.constant 0 : index
    %c0_16 = arith.constant 0 : index
    %19 = vector.load %arg7[%c0_15, %c0_16] : memref<1x768xf32, #tpu.memory_space<vmem>>, vector<1x768xf32>
    %20 = vector.broadcast %19 : vector<1x768xf32> to vector<16x768xf32>
    %21 = arith.addf %18, %20 : vector<16x768xf32>
    %22 = math.tanh %21 : vector<16x768xf32>
    %c0_17 = arith.constant 0 : index
    %c0_18 = arith.constant 0 : index
    %23 = vector.load %arg8[%c0_17, %c0_18] : memref<16x768xf32, #tpu.memory_space<vmem>>, vector<16x768xf32>
    tpu.vector_store %arg8[%c0_17, %c0_18], %22 {strides = array<i32>} : memref<16x768xf32, #tpu.memory_space<vmem>>, vector<16x768xf32>,
    return
  }
  func.func @transform_0(%arg0: i32) -> (i32, i32) {
    %c0_i32 = arith.constant 0 : i32
    %c0_i32_0 = arith.constant 0 : i32
    return %arg0, %c0_i32 : i32, i32
  }
  func.func @transform_1(%arg0: i32) -> (i32, i32) {
    %c0_i32 = arith.constant 0 : i32
    %c0_i32_0 = arith.constant 0 : i32
    %c0_i32_1 = arith.constant 0 : i32
    return %c0_i32, %c0_i32_0 : i32, i32
  }
  func.func @transform_2(%arg0: i32) -> (i32, i32) {
    %c0_i32 = arith.constant 0 : i32
    %c0_i32_0 = arith.constant 0 : i32
    %c0_i32_1 = arith.constant 0 : i32
    return %c0_i32, %c0_i32_0 : i32, i32
  }
  func.func @transform_3(%arg0: i32) -> (i32, i32) {
    %c0_i32 = arith.constant 0 : i32
    %c0_i32_0 = arith.constant 0 : i32
    %c0_i32_1 = arith.constant 0 : i32
    return %c0_i32, %c0_i32_0 : i32, i32
  }
  func.func @transform_4(%arg0: i32) -> (i32, i32) {
    %c0_i32 = arith.constant 0 : i32
    %c0_i32_0 = arith.constant 0 : i32
    %c0_i32_1 = arith.constant 0 : i32
    return %c0_i32, %c0_i32_0 : i32, i32
  }
  func.func @transform_5(%arg0: i32) -> (i32, i32) {
    %c0_i32 = arith.constant 0 : i32
    %c0_i32_0 = arith.constant 0 : i32
    %c0_i32_1 = arith.constant 0 : i32
    return %c0_i32, %c0_i32_0 : i32, i32
  }
  func.func @transform_6(%arg0: i32) -> (i32, i32) {
    %c0_i32 = arith.constant 0 : i32
    %c0_i32_0 = arith.constant 0 : i32
    %c0_i32_1 = arith.constant 0 : i32
    return %c0_i32, %c0_i32_0 : i32, i32
  }
  func.func @transform_7(%arg0: i32) -> (i32, i32) {
    %c0_i32 = arith.constant 0 : i32
    %c0_i32_0 = arith.constant 0 : i32
    return %arg0, %c0_i32 : i32, i32
  }
}

</mosaic_0001>

<bundles_post_ra>
// kernel: generator_forward.1
= control target key start
LH: loop header
LB: loop body
LE: loop exit
PB: predicated region body
PF: predicated region fallthrough
CT: control target
= control target key end

     0   :  { %12 = vsyncpa [#allocation3], 0  ;;  %s3032_s0 = inlined_call_operand.vmem [shape: bf16[16,16], index: 0, kind: input, shape index: {}]   ;;  %s3033_s1 = inlined_call_operand.vmem [shape: bf16[16,256], index: 1, kind: input, shape index: {}]   ;;  %s3034_s2 = inlined_call_operand.hbm [shape: f32[1,256], index: 2, kind: input, shape index: {}]   ;;  %s3035_s3 = inlined_call_operand.hbm [shape: bf16[256,512], index: 3, kind: input, shape index: {}]   ;;  %s3036_s4 = inlined_call_operand.vmem [shape: f32[1,512], index: 4, kind: input, shape index: {}]   ;;  %s3037_s5 = inlined_call_operand.hbm [shape: bf16[512,768], index: 5, kind: input, shape index: {}]   ;;  %s3038_s6 = inlined_call_operand.vmem [shape: f32[1,768], index: 6, kind: input, shape index: {}]   ;;  %s3039_s7 = inlined_call_operand.vmem [shape: f32[16,768], index: 7, kind: output, shape index: {}]  }
   0x1   :  { %13 = vsyncpa [#allocation5], 0  ;;  %s2870_s24 = smov [#allocation4]  }
   0x2   :  { %s33_s25 = sshll.u32 %s2870_s24, 4  ;;  %s34_s25 = int_to_ptr.vmem [resolvable:$true] %s33_s25 }
   0x3   :  { %s2814_s26 = scalar_lea.vmem %s34_s25, 8192  ;;  %p2819_p1 = scmp.lt.s32.totalorder %s34_s25, %s34_s25 }
   0x4   :  { %p2815_p0 = scmp.ne.s32.totalorder %s34_s25, %s2814_s26  ;;  %p2820_p2 = scmp.lt.s32.totalorder %s2814_s26, %s2814_s26 }
   0x6   :  { %p2821_p3 = por %p2820_p2, %p2819_p1 }
   0x8   :  { %p2822_p4 = pnand %p2821_p3, %p2815_p0 }
   0xa   :  { %2825 = shalt.err (!%p2822_p4)
}
   0xb   :  { %s2871_s27 = smov 256   ;;  %s2872_s28 = smov 16  }
   0xc   :  { %39 = dma.hbm_to_vmem [thread:$0]  %s3035_s3, 8192, %s34_s25, [#allocation5], %s2871_s27, %s2871_s27, %s2872_s28  }
   0xd   :  { %s2873_s8 = smov [#allocation2]   ;;  %s2874_s10 = smov [#allocation6]  }
   0xe   :  { %s24_s9 = sshll.u32 %s2873_s8, 4  ;;  %s47_s11 = sshll.u32 %s2874_s10, 4  ;;  %s25_s9 = int_to_ptr.vmem [resolvable:$true] %s24_s9  ;;  %s48_s11 = int_to_ptr.vmem [resolvable:$true] %s47_s11 }
   0xf   :  { %s2834_s12 = scalar_lea.vmem %s25_s9, 32  ;;  %p2839_p6 = scmp.lt.s32.totalorder %s25_s9, %s25_s9 }
  0x10   :  { %p2835_p5 = scmp.ne.s32.totalorder %s25_s9, %s2834_s12  ;;  %p2840_p7 = scmp.lt.s32.totalorder %s2834_s12, %s2834_s12 }
  0x12   :  { %p2841_p8 = por %p2840_p7, %p2839_p6 }
  0x14   :  { %p2842_p9 = pnand %p2841_p8, %p2835_p5 }
  0x16   :  { %2845 = shalt.err (!%p2842_p9)
}
  0x17   :  { %27 = dma.hbm_to_vmem [thread:$0]  %s3034_s2, 32, %s25_s9, [#allocation3]  }
  0x18   :  { %s2854_s15 = scalar_lea.vmem %s48_s11, 24576  ;;  %p2859_p11 = scmp.lt.s32.totalorder %s48_s11, %s48_s11 }
  0x19   :  { %p2855_p10 = scmp.ne.s32.totalorder %s48_s11, %s2854_s15  ;;  %p2860_p12 = scmp.lt.s32.totalorder %s2854_s15, %s2854_s15 }
  0x1b   :  { %p2861_p13 = por %p2860_p12, %p2859_p11 }
  0x1d   :  { %p2862_p0 = pnand %p2861_p13, %p2855_p10 }
  0x1f   :  { %2865 = shalt.err (!%p2862_p0)
}
  0x20   :  { %s2875_s3 = smov 384   ;;  %s2876_s16 = smov 24  }
  0x21   :  { %53 = dma.hbm_to_vmem [thread:$0]  %s3037_s5, 24576, %s48_s11, [#allocation5], %s2875_s3, %s2875_s3, %s2876_s16  }
  0x22   :  { %2866 = dma.done.wait [#allocation3], 32  }
  0x23   :  { %2867 = vsyncadd [#allocation3], 4294967264 }
  0x24   :  { %2868 = dma.done.wait [#allocation5], 32768  }
  0x25   :  { %2869 = vsyncadd [#allocation5], 4294934528  ;;  %v2877_v0 = vmov 0   ;;  %v2394_v1 = vld [vmem:[%s3033_s1 + $0x4] ss:$8 sps:$4 sm:$0xff]   ;;  %vm97_vm0 = vcmask 130048  }
  0x26   :  { %133 = vmatprep.mubr.bf16.mxu0 %v2877_v0  ;;  %v2396_v2 = vld [vmem:[%s3033_s1] ss:$8 sps:$4 sm:$0xff]   ;;  %115 = vmatprep.subr.bf16.mxu0 %v2394_v1 }
  0x27   :  { %v2397_v3 = vld [vmem:[%s3032_s0] sm:$0xff]   ;;  %116 = vmatpush1.bf16.msra.mxu0 %v2396_v2  ;;  %v2400_v5 = vld [vmem:[#allocation4 + $0xe8] ss:$16 sps:$4 sm:$0xff]  }
  0x28   :  { %v2398_v4 = vld [vmem:[#allocation4 + $0xe4] ss:$16 sps:$4 sm:$0xff]   ;;  %v2402_v6 = vld [vmem:[#allocation4 + $0xec] ss:$16 sps:$4 sm:$0xff]   ;;  %v2403_v7 = vld [vmem:[#allocation4 + $0xe0] ss:$16 sps:$4 sm:$0xff]  }
  0x29   :  { %556 = vmatprep.subr.bf16.mxu1 %v2398_v4  ;;  %v2404_v8 = vld [vmem:[#allocation4 + $0xc4] ss:$16 sps:$4 sm:$0xff]   ;;  %599 = vmatprep.subr.bf16.mxu0 %v2402_v6  ;;  %v2406_v9 = vld [vmem:[#allocation4 + $0xc8] ss:$16 sps:$4 sm:$0xff]   ;;  %v2408_v10 = vld [vmem:[#allocation4 + $0xcc] ss:$16 sps:$4 sm:$0xff]   ;;  %v72_v6 = vlaneseq }
  0x2a   :  { %2129 = vmatmul.mubr.msk.bf16.vlgmr.msra.gmra.mxu0 %vm97_vm0, %v2397_v3  ;;  %557 = vmatpush1.bf16.msra.mxu1 %v2403_v7  ;;  %v2409_v11 = vld [vmem:[#allocation4 + $0xc0] ss:$16 sps:$4 sm:$0xff]   ;;  %v2410_v12 = vld [vmem:[#allocation4 + $0xa4] ss:$16 sps:$4 sm:$0xff]   ;;  %v2414_v13 = vld [vmem:[#allocation4 + $0xac] ss:$16 sps:$4 sm:$0xff]  }
  0x2b   :  { %600 = vmatpush1.bf16.msra.mxu0 %v2400_v5  ;;  %558 = vmatprep.subr.bf16.mxu1 %v2404_v8  ;;  %v2412_v14 = vld [vmem:[#allocation4 + $0xa8] ss:$16 sps:$4 sm:$0xff]   ;;  %v2415_v15 = vld [vmem:[#allocation4 + $0xa0] ss:$16 sps:$4 sm:$0xff]   ;;  %v2416_v16 = vld [vmem:[#allocation4 + $0x84] ss:$16 sps:$4 sm:$0xff]  }
  0x2c   :  { %601 = vmatprep.subr.bf16.mxu0 %v2408_v10  ;;  %v2420_v17 = vld [vmem:[#allocation4 + $0x8c] ss:$16 sps:$4 sm:$0xff]   ;;  %v2418_v18 = vld [vmem:[#allocation4 + $0x88] ss:$16 sps:$4 sm:$0xff]   ;;  %v2421_v19 = vld [vmem:[#allocation4 + $0x80] ss:$16 sps:$4 sm:$0xff]  }
  0x2d   :  { %v2422_v20 = vld [vmem:[#allocation4 + $0x64] ss:$16 sps:$4 sm:$0xff]   ;;  %v2426_v21 = vld [vmem:[#allocation4 + $0x6c] ss:$16 sps:$4 sm:$0xff]   ;;  %v2424_v22 = vld [vmem:[#allocation4 + $0x68] ss:$16 sps:$4 sm:$0xff]  }
  0x2e   :  { %559 = vmatpush1.bf16.msra.mxu1 %v2409_v11  ;;  %v2427_v23 = vld [vmem:[#allocation4 + $0x60] ss:$16 sps:$4 sm:$0xff]   ;;  %v2428_v24 = vld [vmem:[#allocation4 + $0x44] ss:$16 sps:$4 sm:$0xff]   ;;  %v2432_v25 = vld [vmem:[#allocation4 + $0x4c] ss:$16 sps:$4 sm:$0xff]  }
  0x2f   :  { %602 = vmatpush1.bf16.msra.mxu0 %v2406_v9  ;;  %560 = vmatprep.subr.bf16.mxu1 %v2410_v12  ;;  %v2430_v26 = vld [vmem:[#allocation4 + $0x48] ss:$16 sps:$4 sm:$0xff]   ;;  %v2433_v27 = vld [vmem:[#allocation4 + $0x40] ss:$16 sps:$4 sm:$0xff]   ;;  %v2434_v28 = vld [vmem:[#allocation4 + $0x24] ss:$16 sps:$4 sm:$0xff]  }
  0x30   :  { %603 = vmatprep.subr.bf16.mxu0 %v2414_v13  ;;  %v2438_v29 = vld [vmem:[#allocation4 + $0x2c] ss:$16 sps:$4 sm:$0xff]   ;;  %v2436_v30 = vld [vmem:[#allocation4 + $0x28] ss:$16 sps:$4 sm:$0xff]   ;;  %v2439_v31 = vld [vmem:[#allocation4 + $0x20] ss:$16 sps:$4 sm:$0xff]  }
  0x31   :  { %v2440_v32 = vld [vmem:[#allocation4 + $0x4] ss:$16 sps:$4 sm:$0xff]   ;;  %v2444_v33 = vld [vmem:[#allocation4 + $0xc] ss:$16 sps:$4 sm:$0xff]   ;;  %v2442_v34 = vld [vmem:[#allocation4 + $0x8] ss:$16 sps:$4 sm:$0xff]  }
  0x32   :  { %561 = vmatpush1.bf16.msra.mxu1 %v2415_v15  ;;  %v2445_v35 = vld [vmem:[#allocation4] ss:$16 sps:$4 sm:$0xff]   ;;  %v2446_v36 = vld [vmem:[#allocation4 + $0x1e4] ss:$16 sps:$4 sm:$0xff]   ;;  %v2450_v37 = vld [vmem:[#allocation4 + $0x1ec] ss:$16 sps:$4 sm:$0xff]  }
  0x33   :  { %604 = vmatpush1.bf16.msra.mxu0 %v2412_v14  ;;  %562 = vmatprep.subr.bf16.mxu1 %v2416_v16  ;;  %v2448_v38 = vld [vmem:[#allocation4 + $0x1e8] ss:$16 sps:$4 sm:$0xff]   ;;  %v2451_v39 = vld [vmem:[#allocation4 + $0x1e0] ss:$16 sps:$4 sm:$0xff]   ;;  %v2452_v40 = vld [vmem:[#allocation4 + $0x1c4] ss:$16 sps:$4 sm:$0xff]  }
  0x34   :  { %605 = vmatprep.subr.bf16.mxu0 %v2420_v17  ;;  %v2456_v41 = vld [vmem:[#allocation4 + $0x1cc] ss:$16 sps:$4 sm:$0xff]   ;;  %v2454_v42 = vld [vmem:[#allocation4 + $0x1c8] ss:$16 sps:$4 sm:$0xff]   ;;  %v2457_v43 = vld [vmem:[#allocation4 + $0x1c0] ss:$16 sps:$4 sm:$0xff]  }
  0x35   :  { %v2458_v44 = vld [vmem:[#allocation4 + $0x1a4] ss:$16 sps:$4 sm:$0xff]   ;;  %v2462_v45 = vld [vmem:[#allocation4 + $0x1ac] ss:$16 sps:$4 sm:$0xff]   ;;  %v2460_v46 = vld [vmem:[#allocation4 + $0x1a8] ss:$16 sps:$4 sm:$0xff]  }
  0x36   :  { %563 = vmatpush1.bf16.msra.mxu1 %v2421_v19  ;;  %v2463_v47 = vld [vmem:[#allocation4 + $0x1a0] ss:$16 sps:$4 sm:$0xff]   ;;  %v2464_v48 = vld [vmem:[#allocation4 + $0x184] ss:$16 sps:$4 sm:$0xff]   ;;  %v2468_v49 = vld [vmem:[#allocation4 + $0x18c] ss:$16 sps:$4 sm:$0xff]  }
  0x37   :  { %606 = vmatpush1.bf16.msra.mxu0 %v2418_v18  ;;  %564 = vmatprep.subr.bf16.mxu1 %v2422_v20  ;;  %v2466_v50 = vld [vmem:[#allocation4 + $0x188] ss:$16 sps:$4 sm:$0xff]   ;;  %v2469_v51 = vld [vmem:[#allocation4 + $0x180] ss:$16 sps:$4 sm:$0xff]   ;;  %v2470_v52 = vld [vmem:[#allocation4 + $0x164] ss:$16 sps:$4 sm:$0xff]  }
  0x38   :  { %607 = vmatprep.subr.bf16.mxu0 %v2426_v21  ;;  %v2474_v53 = vld [vmem:[#allocation4 + $0x16c] ss:$16 sps:$4 sm:$0xff]   ;;  %v2472_v54 = vld [vmem:[#allocation4 + $0x168] ss:$16 sps:$4 sm:$0xff]   ;;  %v2475_v55 = vld [vmem:[#allocation4 + $0x160] ss:$16 sps:$4 sm:$0xff]  }
  0x39   :  { %v2476_v56 = vld [vmem:[#allocation4 + $0x144] ss:$16 sps:$4 sm:$0xff]   ;;  %v2480_v57 = vld [vmem:[#allocation4 + $0x14c] ss:$16 sps:$4 sm:$0xff]   ;;  %v2478_v58 = vld [vmem:[#allocation4 + $0x148] ss:$16 sps:$4 sm:$0xff]  }
  0x3a   :  { %565 = vmatpush1.bf16.msra.mxu1 %v2427_v23  ;;  %v2481_v59 = vld [vmem:[#allocation4 + $0x140] ss:$16 sps:$4 sm:$0xff]   ;;  %v2482_v60 = vld [vmem:[#allocation4 + $0x124] ss:$16 sps:$4 sm:$0xff]   ;;  %v2486_v61 = vld [vmem:[#allocation4 + $0x12c] ss:$16 sps:$4 sm:$0xff]  }
  0x3b   :  { %608 = vmatpush1.bf16.msra.mxu0 %v2424_v22  ;;  %566 = vmatprep.subr.bf16.mxu1 %v2428_v24  ;;  %v2484_v62 = vld [vmem:[#allocation4 + $0x128] ss:$16 sps:$4 sm:$0xff]   ;;  %v2487_v63 = vld [vmem:[#allocation4 + $0x120] ss:$16 sps:$4 sm:$0xff]   ;;  %v2488_v0 = vld [vmem:[#allocation4 + $0x104] ss:$16 sps:$4 sm:$0xff]  }
  0x3c   :  { %609 = vmatprep.subr.bf16.mxu0 %v2432_v25  ;;  %v2492_v1 = vld [vmem:[#allocation4 + $0x10c] ss:$16 sps:$4 sm:$0xff]   ;;  %v2490_v2 = vld [vmem:[#allocation4 + $0x108] ss:$16 sps:$4 sm:$0xff]   ;;  %v2493_v3 = vld [vmem:[#allocation4 + $0x100] ss:$16 sps:$4 sm:$0xff]  }
  0x3d   :  { %v2496_v4 = vld [vmem:[#allocation6 + $0x154] ss:$24 sps:$4 sm:$0xff]   ;;  %v2936_v7 = vshrl.u32 %v72_v6, 7  ;;  %v70_v10 = vld [vmem:[#allocation2] sm:$0x3] }
  0x3e   :  { %567 = vmatpush1.bf16.msra.mxu1 %v2433_v27  ;;  %v2499_v5 = vld [vmem:[#allocation6 + $0x454] ss:$24 sps:$4 sm:$0xff]   ;;  %v2497_v27 = vld [vmem:[#allocation6 + $0x450] ss:$24 sps:$4 sm:$0xff]   ;;  %v2565_v6 = vld [vmem:[#allocation6 + $0x544] ss:$24 sps:$4 sm:$0xff]  }
  0x3f   :  { %610 = vmatpush1.bf16.msra.mxu0 %v2430_v26  ;;  %568 = vmatprep.subr.bf16.mxu1 %v2434_v28  ;;  %v2939_v8 = vsub.s32 1, %v2936_v7  ;;  %v2942_v9 = vsub.s32 0, %v2936_v7  ;;  %v2494_v26 = vld [vmem:[#allocation6 + $0x150] ss:$24 sps:$4 sm:$0xff]  }
  0x40   :  { %611 = vmatprep.subr.bf16.mxu0 %v2438_v29  ;;  %v2502_v29 = vld [vmem:[#allocation6 + $0x124] ss:$24 sps:$4 sm:$0xff]  }
  0x41   :  { %v79_v12 = vrot.slane %v70_v10, %v2939_v8  ;;  %v75_v13 = vrot.slane %v70_v10, %v2942_v9  ;;  %v2560_v10 = vld [vmem:[#allocation6 + $0x240] ss:$24 sps:$4 sm:$0xff]  }
  0x42   :  { %569 = vmatpush1.bf16.msra.mxu1 %v2439_v31  ;;  %v2500_v31 = vld [vmem:[#allocation6 + $0x120] ss:$24 sps:$4 sm:$0xff]  }
  0x43   :  { %612 = vmatpush1.bf16.msra.mxu0 %v2436_v30  ;;  %570 = vmatprep.subr.bf16.mxu1 %v2440_v32  ;;  %v2505_v30 = vld [vmem:[#allocation6 + $0x424] ss:$24 sps:$4 sm:$0xff]   ;;  %v2503_v32 = vld [vmem:[#allocation6 + $0x420] ss:$24 sps:$4 sm:$0xff]  }
  0x44   :  { %613 = vmatprep.subr.bf16.mxu0 %v2444_v33  ;;  %v2508_v33 = vld [vmem:[#allocation6 + $0xf4] ss:$24 sps:$4 sm:$0xff]  }
  0x46   :  { %571 = vmatpush1.bf16.msra.mxu1 %v2445_v35  ;;  %v2506_v35 = vld [vmem:[#allocation6 + $0xf0] ss:$24 sps:$4 sm:$0xff]  }
  0x47   :  { %614 = vmatpush1.bf16.msra.mxu0 %v2442_v34  ;;  %572 = vmatprep.subr.bf16.mxu1 %v2446_v36  ;;  %v2511_v34 = vld [vmem:[#allocation6 + $0x3f4] ss:$24 sps:$4 sm:$0xff]   ;;  %v2509_v36 = vld [vmem:[#allocation6 + $0x3f0] ss:$24 sps:$4 sm:$0xff]  }
  0x48   :  { %615 = vmatprep.subr.bf16.mxu0 %v2450_v37  ;;  %v2514_v37 = vld [vmem:[#allocation6 + $0xc4] ss:$24 sps:$4 sm:$0xff]  }
  0x4a   :  { %573 = vmatpush2.bf16.msra.mxu1 %v2451_v39  ;;  %v2512_v39 = vld [vmem:[#allocation6 + $0xc0] ss:$24 sps:$4 sm:$0xff]  }
  0x4b   :  { %616 = vmatpush2.bf16.msra.mxu0 %v2448_v38  ;;  %574 = vmatprep.subr.bf16.mxu1 %v2452_v40  ;;  %v2517_v38 = vld [vmem:[#allocation6 + $0x3c4] ss:$24 sps:$4 sm:$0xff]   ;;  %v2515_v40 = vld [vmem:[#allocation6 + $0x3c0] ss:$24 sps:$4 sm:$0xff]  }
  0x4c   :  { %617 = vmatprep.subr.bf16.mxu0 %v2456_v41  ;;  %v2520_v41 = vld [vmem:[#allocation6 + $0x94] ss:$24 sps:$4 sm:$0xff]  }
  0x4e   :  { %575 = vmatpush2.bf16.msra.mxu1 %v2457_v43  ;;  %v2518_v43 = vld [vmem:[#allocation6 + $0x90] ss:$24 sps:$4 sm:$0xff]  }
  0x4f   :  { %618 = vmatpush2.bf16.msra.mxu0 %v2454_v42  ;;  %576 = vmatprep.subr.bf16.mxu1 %v2458_v44  ;;  %v2523_v42 = vld [vmem:[#allocation6 + $0x394] ss:$24 sps:$4 sm:$0xff]   ;;  %v2521_v44 = vld [vmem:[#allocation6 + $0x390] ss:$24 sps:$4 sm:$0xff]  }
  0x50   :  { %619 = vmatprep.subr.bf16.mxu0 %v2462_v45  ;;  %v2526_v45 = vld [vmem:[#allocation6 + $0x64] ss:$24 sps:$4 sm:$0xff]  }
  0x52   :  { %577 = vmatpush2.bf16.msra.mxu1 %v2463_v47  ;;  %v2524_v47 = vld [vmem:[#allocation6 + $0x60] ss:$24 sps:$4 sm:$0xff]  }
  0x53   :  { %620 = vmatpush2.bf16.msra.mxu0 %v2460_v46  ;;  %578 = vmatprep.subr.bf16.mxu1 %v2464_v48  ;;  %v2529_v46 = vld [vmem:[#allocation6 + $0x364] ss:$24 sps:$4 sm:$0xff]   ;;  %v2527_v48 = vld [vmem:[#allocation6 + $0x360] ss:$24 sps:$4 sm:$0xff]  }
  0x54   :  { %621 = vmatprep.subr.bf16.mxu0 %v2468_v49  ;;  %v2532_v49 = vld [vmem:[#allocation6 + $0x34] ss:$24 sps:$4 sm:$0xff]  }
  0x56   :  { %579 = vmatpush2.bf16.msra.mxu1 %v2469_v51  ;;  %v2530_v51 = vld [vmem:[#allocation6 + $0x30] ss:$24 sps:$4 sm:$0xff]  }
  0x57   :  { %622 = vmatpush2.bf16.msra.mxu0 %v2466_v50  ;;  %580 = vmatprep.subr.bf16.mxu1 %v2470_v52  ;;  %v2535_v50 = vld [vmem:[#allocation6 + $0x334] ss:$24 sps:$4 sm:$0xff]   ;;  %v2533_v52 = vld [vmem:[#allocation6 + $0x330] ss:$24 sps:$4 sm:$0xff]  }
  0x58   :  { %623 = vmatprep.subr.bf16.mxu0 %v2474_v53  ;;  %v2538_v53 = vld [vmem:[#allocation6 + $0x4] ss:$24 sps:$4 sm:$0xff]  }
  0x5a   :  { %581 = vmatpush2.bf16.msra.mxu1 %v2475_v55  ;;  %v2536_v55 = vld [vmem:[#allocation6] ss:$24 sps:$4 sm:$0xff]  }
  0x5b   :  { %624 = vmatpush2.bf16.msra.mxu0 %v2472_v54  ;;  %582 = vmatprep.subr.bf16.mxu1 %v2476_v56  ;;  %v2541_v54 = vld [vmem:[#allocation6 + $0x304] ss:$24 sps:$4 sm:$0xff]   ;;  %v2539_v56 = vld [vmem:[#allocation6 + $0x300] ss:$24 sps:$4 sm:$0xff]  }
  0x5c   :  { %625 = vmatprep.subr.bf16.mxu0 %v2480_v57  ;;  %v2544_v57 = vld [vmem:[#allocation6 + $0x2d4] ss:$24 sps:$4 sm:$0xff]  }
  0x5e   :  { %583 = vmatpush2.bf16.msra.mxu1 %v2481_v59  ;;  %v2542_v59 = vld [vmem:[#allocation6 + $0x2d0] ss:$24 sps:$4 sm:$0xff]  }
  0x5f   :  { %626 = vmatpush2.bf16.msra.mxu0 %v2478_v58  ;;  %584 = vmatprep.subr.bf16.mxu1 %v2482_v60  ;;  %v2547_v58 = vld [vmem:[#allocation6 + $0x5d4] ss:$24 sps:$4 sm:$0xff]   ;;  %v2545_v60 = vld [vmem:[#allocation6 + $0x5d0] ss:$24 sps:$4 sm:$0xff]  }
  0x60   :  { %627 = vmatprep.subr.bf16.mxu0 %v2486_v61  ;;  %v2550_v61 = vld [vmem:[#allocation6 + $0x2a4] ss:$24 sps:$4 sm:$0xff]  }
  0x62   :  { %585 = vmatpush2.bf16.msra.mxu1 %v2487_v63  ;;  %v2548_v63 = vld [vmem:[#allocation6 + $0x2a0] ss:$24 sps:$4 sm:$0xff]  }
  0x63   :  { %628 = vmatpush2.bf16.msra.mxu0 %v2484_v62  ;;  %586 = vmatprep.subr.bf16.mxu1 %v2488_v0  ;;  %v2553_v62 = vld [vmem:[#allocation6 + $0x5a4] ss:$24 sps:$4 sm:$0xff]   ;;  %v2551_v0 = vld [vmem:[#allocation6 + $0x5a0] ss:$24 sps:$4 sm:$0xff]  }
  0x64   :  { %629 = vmatprep.subr.bf16.mxu0 %v2492_v1  ;;  %v2556_v1 = vld [vmem:[#allocation6 + $0x274] ss:$24 sps:$4 sm:$0xff]  }
  0x66   :  { %587 = vmatpush2.bf16.msra.mxu1 %v2493_v3  ;;  %v2554_v3 = vld [vmem:[#allocation6 + $0x270] ss:$24 sps:$4 sm:$0xff]  }
  0x67   :  { %630 = vmatpush2.bf16.msra.mxu0 %v2490_v2  ;;  %1838 = vmatprep.subr.bf16.mxu1 %v2496_v4  ;;  %v2559_v2 = vld [vmem:[#allocation6 + $0x574] ss:$24 sps:$4 sm:$0xff]   ;;  %v2557_v4 = vld [vmem:[#allocation6 + $0x570] ss:$24 sps:$4 sm:$0xff]  }
  0x68   :  { %1881 = vmatprep.subr.bf16.mxu0 %v2499_v5  ;;  %v2562_v5 = vld [vmem:[#allocation6 + $0x244] ss:$24 sps:$4 sm:$0xff]  }
  0xea   :  { %v135_v11 = vpop.f32.mrf.mxu0 }
  0xeb   :  { %v136_v18 = vadd.f32 %v135_v11, %v75_v13  ;;  %v2563_v11 = vld [vmem:[#allocation6 + $0x540] ss:$24 sps:$4 sm:$0xff]  }
  0xec   :  { %v137_v14 = vpop.f32.mrf.mxu0 }
  0xed   :  { %v138_v16 = vadd.f32 %v137_v14, %v79_v12  ;;  %v144_v24 = vmax.f32 %v136_v18, 0.0  ;;  %v2566_v14 = vld [vmem:[#allocation6 + $0x210] ss:$24 sps:$4 sm:$0xff]   ;;  %v2572_v18 = vld [vmem:[#allocation6 + $0x1e0] ss:$24 sps:$4 sm:$0xff]  }
  0xee   :  { %v139_v15 = vpop.f32.mrf.mxu0 }
  0xef   :  { %v140_v17 = vadd.f32 %v139_v15, %v75_v13  ;;  %v145_v22 = vmax.f32 %v138_v16, 0.0  ;;  %v2571_v13 = vld [vmem:[#allocation6 + $0x514] ss:$24 sps:$4 sm:$0xff]   ;;  %v2569_v15 = vld [vmem:[#allocation6 + $0x510] ss:$24 sps:$4 sm:$0xff]  }
  0xf0   :  { %v141_v19 = vpop.f32.mrf.mxu0  ;;  %v2574_v16 = vld [vmem:[#allocation6 + $0x1e4] ss:$24 sps:$4 sm:$0xff]  }
  0xf1   :  { %v142_v20 = vadd.f32 %v141_v19, %v79_v12  ;;  %v146_v21 = vmax.f32 %v140_v17, 0.0  ;;  %v2568_v12 = vld [vmem:[#allocation6 + $0x214] ss:$24 sps:$4 sm:$0xff]   ;;  %v2577_v17 = vld [vmem:[#allocation6 + $0x4e4] ss:$24 sps:$4 sm:$0xff]  }
  0xf2   :  { %v2575_v19 = vld [vmem:[#allocation6 + $0x4e0] ss:$24 sps:$4 sm:$0xff]  }
  0xf3   :  { %v147_v23 = vmax.f32 %v142_v20, 0.0  ;;  %v148_v28 = vpack.c.bf16 %v146_v21, %v144_v24  ;;  %v2580_v20 = vld [vmem:[#allocation6 + $0x1b4] ss:$24 sps:$4 sm:$0xff]   ;;  %v2586_v24 = vld [vmem:[#allocation6 + $0x184] ss:$24 sps:$4 sm:$0xff]  }
  0xf4   :  { %v2583_v21 = vld [vmem:[#allocation6 + $0x4b4] ss:$24 sps:$4 sm:$0xff]  }
  0xf5   :  { %v149_v25 = vpack.c.bf16 %v147_v23, %v145_v22  ;;  %v2578_v22 = vld [vmem:[#allocation6 + $0x1b0] ss:$24 sps:$4 sm:$0xff]  }
  0xf6   :  { %v2581_v23 = vld [vmem:[#allocation6 + $0x4b0] ss:$24 sps:$4 sm:$0xff]  }
  0xf7   :  { %588 = vmatprep.mubr.bf16.mxu1 %v149_v25  ;;  %631 = vmatprep.mubr.bf16.mxu0 %v149_v25  ;;  %v2589_v25 = vld [vmem:[#allocation6 + $0x484] ss:$24 sps:$4 sm:$0xff]  }
  0xf8   :  { %589 = vmatmul.mubr.bf16.vlgmr.msra.gmra.mxu1 %v148_v28  ;;  %632 = vmatmul.mubr.bf16.vlgmr.msra.gmra.mxu0 %v148_v28  ;;  %v2592_v28 = vld [vmem:[#allocation6 + $0x15c] ss:$24 sps:$4 sm:$0xff]  }
  0xf9   :  { %1839 = vmatpush1.bf16.msra.mxu1 %v2494_v26  ;;  %1882 = vmatpush1.bf16.msra.mxu0 %v2497_v27  ;;  %v2584_v26 = vld [vmem:[#allocation6 + $0x180] ss:$24 sps:$4 sm:$0xff]  }
  0xfa   :  { %1840 = vmatprep.subr.bf16.mxu1 %v2502_v29  ;;  %1883 = vmatprep.subr.bf16.mxu0 %v2505_v30  ;;  %v2587_v27 = vld [vmem:[#allocation6 + $0x480] ss:$24 sps:$4 sm:$0xff]   ;;  %v2595_v29 = vld [vmem:[#allocation6 + $0x45c] ss:$24 sps:$4 sm:$0xff]   ;;  %v230_v30 = vsub.s32 3, %v2936_v7 }
  0xfd   :  { %1841 = vmatpush1.bf16.msra.mxu1 %v2500_v31  ;;  %1884 = vmatpush1.bf16.msra.mxu0 %v2503_v32  ;;  %v226_v31 = vsub.s32 2, %v2936_v7  ;;  %v214_v32 = vld [vmem:[%s3036_s4] sm:$0xf] }
  0xfe   :  { %1842 = vmatprep.subr.bf16.mxu1 %v2508_v33  ;;  %1885 = vmatprep.subr.bf16.mxu0 %v2511_v34 }
 0x101   :  { %1843 = vmatpush1.bf16.msra.mxu1 %v2506_v35  ;;  %1886 = vmatpush1.bf16.msra.mxu0 %v2509_v36  ;;  %v223_v35 = vrot.slane %v214_v32, %v2939_v8  ;;  %v231_v36 = vrot.slane %v214_v32, %v230_v30 }
 0x102   :  { %1844 = vmatprep.subr.bf16.mxu1 %v2514_v37  ;;  %1887 = vmatprep.subr.bf16.mxu0 %v2517_v38  ;;  %v219_v37 = vrot.slane %v214_v32, %v2942_v9  ;;  %v227_v38 = vrot.slane %v214_v32, %v226_v31  ;;  %v2634_v32 = vld [vmem:[#allocation6 + $0xc] ss:$24 sps:$4 sm:$0xff]  }
 0x105   :  { %1845 = vmatpush1.bf16.msra.mxu1 %v2512_v39  ;;  %1888 = vmatpush1.bf16.msra.mxu0 %v2515_v40 }
 0x106   :  { %1846 = vmatprep.subr.bf16.mxu1 %v2520_v41  ;;  %1889 = vmatprep.subr.bf16.mxu0 %v2523_v42 }
 0x109   :  { %1847 = vmatpush1.bf16.msra.mxu1 %v2518_v43  ;;  %1890 = vmatpush1.bf16.msra.mxu0 %v2521_v44 }
 0x10a   :  { %1848 = vmatprep.subr.bf16.mxu1 %v2526_v45  ;;  %1891 = vmatprep.subr.bf16.mxu0 %v2529_v46 }
 0x10d   :  { %1849 = vmatpush1.bf16.msra.mxu1 %v2524_v47  ;;  %1892 = vmatpush1.bf16.msra.mxu0 %v2527_v48 }
 0x10e   :  { %1850 = vmatprep.subr.bf16.mxu1 %v2532_v49  ;;  %1893 = vmatprep.subr.bf16.mxu0 %v2535_v50 }
 0x111   :  { %1851 = vmatpush1.bf16.msra.mxu1 %v2530_v51  ;;  %1894 = vmatpush1.bf16.msra.mxu0 %v2533_v52 }
 0x112   :  { %1852 = vmatprep.subr.bf16.mxu1 %v2538_v53  ;;  %1895 = vmatprep.subr.bf16.mxu0 %v2541_v54 }
 0x115   :  { %1853 = vmatpush1.bf16.msra.mxu1 %v2536_v55  ;;  %1896 = vmatpush1.bf16.msra.mxu0 %v2539_v56 }
 0x116   :  { %1854 = vmatprep.subr.bf16.mxu1 %v2544_v57  ;;  %1897 = vmatprep.subr.bf16.mxu0 %v2547_v58 }
 0x119   :  { %1855 = vmatpush2.bf16.msra.mxu1 %v2542_v59  ;;  %1898 = vmatpush2.bf16.msra.mxu0 %v2545_v60 }
 0x11a   :  { %1856 = vmatprep.subr.bf16.mxu1 %v2550_v61  ;;  %1899 = vmatprep.subr.bf16.mxu0 %v2553_v62 }
 0x11d   :  { %1857 = vmatpush2.bf16.msra.mxu1 %v2548_v63  ;;  %1900 = vmatpush2.bf16.msra.mxu0 %v2551_v0  ;;  %v2590_v63 = vld [vmem:[#allocation6 + $0x158] ss:$24 sps:$4 sm:$0xff]  }
 0x11e   :  { %1858 = vmatprep.subr.bf16.mxu1 %v2556_v1  ;;  %1901 = vmatprep.subr.bf16.mxu0 %v2559_v2  ;;  %v2593_v0 = vld [vmem:[#allocation6 + $0x458] ss:$24 sps:$4 sm:$0xff]  }
 0x121   :  { %1859 = vmatpush2.bf16.msra.mxu1 %v2554_v3  ;;  %1902 = vmatpush2.bf16.msra.mxu0 %v2557_v4  ;;  %v2598_v3 = vld [vmem:[#allocation6 + $0x12c] ss:$24 sps:$4 sm:$0xff]  }
 0x122   :  { %1860 = vmatprep.subr.bf16.mxu1 %v2562_v5  ;;  %1903 = vmatprep.subr.bf16.mxu0 %v2565_v6  ;;  %v2601_v4 = vld [vmem:[#allocation6 + $0x42c] ss:$24 sps:$4 sm:$0xff]   ;;  %v2596_v5 = vld [vmem:[#allocation6 + $0x128] ss:$24 sps:$4 sm:$0xff]  }
 0x123   :  { %v2599_v6 = vld [vmem:[#allocation6 + $0x428] ss:$24 sps:$4 sm:$0xff]  }
 0x125   :  { %1861 = vmatpush2.bf16.msra.mxu1 %v2560_v10  ;;  %1904 = vmatpush2.bf16.msra.mxu0 %v2563_v11  ;;  %v2604_v10 = vld [vmem:[#allocation6 + $0xfc] ss:$24 sps:$4 sm:$0xff]  }
 0x126   :  { %1862 = vmatprep.subr.bf16.mxu1 %v2568_v12  ;;  %1905 = vmatprep.subr.bf16.mxu0 %v2571_v13  ;;  %v2607_v11 = vld [vmem:[#allocation6 + $0x3fc] ss:$24 sps:$4 sm:$0xff]   ;;  %v2602_v12 = vld [vmem:[#allocation6 + $0xf8] ss:$24 sps:$4 sm:$0xff]  }
 0x127   :  { %v2605_v13 = vld [vmem:[#allocation6 + $0x3f8] ss:$24 sps:$4 sm:$0xff]  }
 0x129   :  { %1863 = vmatpush2.bf16.msra.mxu1 %v2566_v14  ;;  %1906 = vmatpush2.bf16.msra.mxu0 %v2569_v15  ;;  %v2610_v14 = vld [vmem:[#allocation6 + $0xcc] ss:$24 sps:$4 sm:$0xff]  }
 0x12a   :  { %1864 = vmatprep.subr.bf16.mxu1 %v2574_v16  ;;  %1907 = vmatprep.subr.bf16.mxu0 %v2577_v17  ;;  %v2613_v15 = vld [vmem:[#allocation6 + $0x3cc] ss:$24 sps:$4 sm:$0xff]   ;;  %v2608_v16 = vld [vmem:[#allocation6 + $0xc8] ss:$24 sps:$4 sm:$0xff]  }
 0x12b   :  { %v2611_v17 = vld [vmem:[#allocation6 + $0x3c8] ss:$24 sps:$4 sm:$0xff]  }
 0x12d   :  { %1865 = vmatpush2.bf16.msra.mxu1 %v2572_v18  ;;  %1908 = vmatpush2.bf16.msra.mxu0 %v2575_v19  ;;  %v2616_v18 = vld [vmem:[#allocation6 + $0x9c] ss:$24 sps:$4 sm:$0xff]  }
 0x12e   :  { %1866 = vmatprep.subr.bf16.mxu1 %v2580_v20  ;;  %1909 = vmatprep.subr.bf16.mxu0 %v2583_v21  ;;  %v2619_v19 = vld [vmem:[#allocation6 + $0x39c] ss:$24 sps:$4 sm:$0xff]   ;;  %v2614_v20 = vld [vmem:[#allocation6 + $0x98] ss:$24 sps:$4 sm:$0xff]  }
 0x12f   :  { %v2617_v21 = vld [vmem:[#allocation6 + $0x398] ss:$24 sps:$4 sm:$0xff]  }
 0x131   :  { %1867 = vmatpush2.bf16.msra.mxu1 %v2578_v22  ;;  %1910 = vmatpush2.bf16.msra.mxu0 %v2581_v23  ;;  %v2622_v22 = vld [vmem:[#allocation6 + $0x6c] ss:$24 sps:$4 sm:$0xff]  }
 0x132   :  { %1868 = vmatprep.subr.bf16.mxu1 %v2586_v24  ;;  %1911 = vmatprep.subr.bf16.mxu0 %v2589_v25  ;;  %v2625_v23 = vld [vmem:[#allocation6 + $0x36c] ss:$24 sps:$4 sm:$0xff]   ;;  %v2620_v24 = vld [vmem:[#allocation6 + $0x68] ss:$24 sps:$4 sm:$0xff]  }
 0x133   :  { %v2623_v25 = vld [vmem:[#allocation6 + $0x368] ss:$24 sps:$4 sm:$0xff]  }
 0x135   :  { %1869 = vmatpush2.bf16.msra.mxu1 %v2584_v26  ;;  %1912 = vmatpush2.bf16.msra.mxu0 %v2587_v27  ;;  %v2628_v26 = vld [vmem:[#allocation6 + $0x3c] ss:$24 sps:$4 sm:$0xff]  }
 0x136   :  { %1924 = vmatprep.subr.bf16.mxu1 %v2592_v28  ;;  %1967 = vmatprep.subr.bf16.mxu0 %v2595_v29  ;;  %v2631_v27 = vld [vmem:[#allocation6 + $0x33c] ss:$24 sps:$4 sm:$0xff]   ;;  %v2626_v28 = vld [vmem:[#allocation6 + $0x38] ss:$24 sps:$4 sm:$0xff]  }
 0x137   :  { %v2629_v29 = vld [vmem:[#allocation6 + $0x338] ss:$24 sps:$4 sm:$0xff]  }
 0x1b8   :  { %v590_v33 = vpop.f32.mrf.mxu1  ;;  %v633_v34 = vpop.f32.mrf.mxu0 }
 0x1b9   :  { %v591_v47 = vadd.f32 %v590_v33, %v219_v37  ;;  %v634_v48 = vadd.f32 %v633_v34, %v227_v38  ;;  %v2637_v33 = vld [vmem:[#allocation6 + $0x30c] ss:$24 sps:$4 sm:$0xff]   ;;  %v2632_v34 = vld [vmem:[#allocation6 + $0x8] ss:$24 sps:$4 sm:$0xff]  }
 0x1ba   :  { %v592_v39 = vpop.f32.mrf.mxu1  ;;  %v635_v40 = vpop.f32.mrf.mxu0 }
 0x1bb   :  { %v593_v43 = vadd.f32 %v592_v39, %v223_v35  ;;  %v636_v44 = vadd.f32 %v635_v40, %v231_v36  ;;  %v642_v59 = vmax.f32 %v591_v47, 0.0  ;;  %v644_v60 = vmax.f32 %v634_v48, 0.0  ;;  %v2641_v39 = vld [vmem:[#allocation6 + $0x5d8] ss:$24 sps:$4 sm:$0xff]   ;;  %v2646_v40 = vld [vmem:[#allocation6 + $0x2ac] ss:$24 sps:$4 sm:$0xff]  }
 0x1bc   :  { %v594_v41 = vpop.f32.mrf.mxu1  ;;  %v637_v42 = vpop.f32.mrf.mxu0  ;;  %v2653_v47 = vld [vmem:[#allocation6 + $0x578] ss:$24 sps:$4 sm:$0xff]   ;;  %v2658_v48 = vld [vmem:[#allocation6 + $0x24c] ss:$24 sps:$4 sm:$0xff]  }
 0x1bd   :  { %v595_v45 = vadd.f32 %v594_v41, %v219_v37  ;;  %v638_v46 = vadd.f32 %v637_v42, %v227_v38  ;;  %v643_v55 = vmax.f32 %v593_v43, 0.0  ;;  %v645_v56 = vmax.f32 %v636_v44, 0.0  ;;  %v2643_v37 = vld [vmem:[#allocation6 + $0x5dc] ss:$24 sps:$4 sm:$0xff]   ;;  %v2638_v38 = vld [vmem:[#allocation6 + $0x2d8] ss:$24 sps:$4 sm:$0xff]  }
 0x1be   :  { %v596_v49 = vpop.f32.mrf.mxu1  ;;  %v639_v50 = vpop.f32.mrf.mxu0  ;;  %v2649_v41 = vld [vmem:[#allocation6 + $0x5ac] ss:$24 sps:$4 sm:$0xff]   ;;  %v2644_v42 = vld [vmem:[#allocation6 + $0x2a8] ss:$24 sps:$4 sm:$0xff]   ;;  %v2652_v44 = vld [vmem:[#allocation6 + $0x27c] ss:$24 sps:$4 sm:$0xff]  }
 0x1bf   :  { %v597_v51 = vadd.f32 %v596_v49, %v223_v35  ;;  %v640_v52 = vadd.f32 %v639_v50, %v231_v36  ;;  %v646_v53 = vmax.f32 %v595_v45, 0.0  ;;  %v648_v54 = vmax.f32 %v638_v46, 0.0  ;;  %v2635_v35 = vld [vmem:[#allocation6 + $0x308] ss:$24 sps:$4 sm:$0xff]   ;;  %v2640_v36 = vld [vmem:[#allocation6 + $0x2dc] ss:$24 sps:$4 sm:$0xff]  }
 0x1c0   :  { %v2647_v43 = vld [vmem:[#allocation6 + $0x5a8] ss:$24 sps:$4 sm:$0xff]   ;;  %v2655_v45 = vld [vmem:[#allocation6 + $0x57c] ss:$24 sps:$4 sm:$0xff]   ;;  %v2650_v46 = vld [vmem:[#allocation6 + $0x278] ss:$24 sps:$4 sm:$0xff]  }
 0x1c1   :  { %v647_v57 = vmax.f32 %v597_v51, 0.0  ;;  %v649_v58 = vmax.f32 %v640_v52, 0.0  ;;  %v2961_v1 = vpack.c.bf16 %v646_v53, %v642_v59  ;;  %v2963_v2 = vpack.c.bf16 %v648_v54, %v644_v60  ;;  %v2661_v49 = vld [vmem:[#allocation6 + $0x54c] ss:$24 sps:$4 sm:$0xff]   ;;  %v2656_v50 = vld [vmem:[#allocation6 + $0x248] ss:$24 sps:$4 sm:$0xff]  }
 0x1c2   :  { %v2659_v51 = vld [vmem:[#allocation6 + $0x548] ss:$24 sps:$4 sm:$0xff]   ;;  %v2664_v52 = vld [vmem:[#allocation6 + $0x21c] ss:$24 sps:$4 sm:$0xff]   ;;  %v2662_v54 = vld [vmem:[#allocation6 + $0x218] ss:$24 sps:$4 sm:$0xff]  }
 0x1c3   :  { %v2957_v61 = vpack.c.bf16 %v647_v57, %v643_v55  ;;  %v2959_v62 = vpack.c.bf16 %v649_v58, %v645_v56  ;;  %v2667_v53 = vld [vmem:[#allocation6 + $0x51c] ss:$24 sps:$4 sm:$0xff]   ;;  %v2665_v55 = vld [vmem:[#allocation6 + $0x518] ss:$24 sps:$4 sm:$0xff]   ;;  %v2670_v56 = vld [vmem:[#allocation6 + $0x1ec] ss:$24 sps:$4 sm:$0xff]  }
 0x1c4   :  { %v2673_v57 = vld [vmem:[#allocation6 + $0x4ec] ss:$24 sps:$4 sm:$0xff]   ;;  %v2668_v58 = vld [vmem:[#allocation6 + $0x1e8] ss:$24 sps:$4 sm:$0xff]   ;;  %v2676_v60 = vld [vmem:[#allocation6 + $0x1bc] ss:$24 sps:$4 sm:$0xff]  }
 0x1c5   :  { %1870 = vmatprep.mubr.bf16.mxu1 %v2957_v61  ;;  %1913 = vmatprep.mubr.bf16.mxu0 %v2959_v62  ;;  %v2671_v59 = vld [vmem:[#allocation6 + $0x4e8] ss:$24 sps:$4 sm:$0xff]  }
 0x1c6   :  { %1871 = vmatmul.mubr.bf16.vlgmr.msra.gmra.mxu1 %v2961_v1  ;;  %1914 = vmatmul.mubr.bf16.vlgmr.msra.gmra.mxu0 %v2963_v2 }
 0x1c7   :  { %1925 = vmatpush1.bf16.msra.mxu1 %v2590_v63  ;;  %1968 = vmatpush1.bf16.msra.mxu0 %v2593_v0  ;;  %v2679_v63 = vld [vmem:[#allocation6 + $0x4bc] ss:$24 sps:$4 sm:$0xff]   ;;  %v2674_v0 = vld [vmem:[#allocation6 + $0x1b8] ss:$24 sps:$4 sm:$0xff]  }
 0x1c8   :  { %1956 = vmatprep.mubr.bf16.mxu1 %v2957_v61  ;;  %1999 = vmatprep.mubr.bf16.mxu0 %v2959_v62 }
 0x1c9   :  { %1926 = vmatprep.subr.bf16.mxu1 %v2598_v3  ;;  %1969 = vmatprep.subr.bf16.mxu0 %v2601_v4  ;;  %v2677_v3 = vld [vmem:[#allocation6 + $0x4b8] ss:$24 sps:$4 sm:$0xff]   ;;  %v2682_v4 = vld [vmem:[#allocation6 + $0x18c] ss:$24 sps:$4 sm:$0xff]  }
 0x1cb   :  { %1927 = vmatpush1.bf16.msra.mxu1 %v2596_v5  ;;  %1970 = vmatpush1.bf16.msra.mxu0 %v2599_v6  ;;  %v2685_v5 = vld [vmem:[#allocation6 + $0x48c] ss:$24 sps:$4 sm:$0xff]   ;;  %v2680_v6 = vld [vmem:[#allocation6 + $0x188] ss:$24 sps:$4 sm:$0xff]  }
 0x1cc   :  { %1928 = vmatprep.subr.bf16.mxu1 %v2604_v10  ;;  %1971 = vmatprep.subr.bf16.mxu0 %v2607_v11  ;;  %v2683_v10 = vld [vmem:[#allocation6 + $0x488] ss:$24 sps:$4 sm:$0xff]   ;;  %v2688_v11 = vld [vmem:[#allocation6 + $0x164] ss:$24 sps:$4 sm:$0xff]  }
 0x1cf   :  { %1929 = vmatpush1.bf16.msra.mxu1 %v2602_v12  ;;  %1972 = vmatpush1.bf16.msra.mxu0 %v2605_v13  ;;  %v2691_v12 = vld [vmem:[#allocation6 + $0x464] ss:$24 sps:$4 sm:$0xff]   ;;  %v2686_v13 = vld [vmem:[#allocation6 + $0x160] ss:$24 sps:$4 sm:$0xff]  }
 0x1d0   :  { %1930 = vmatprep.subr.bf16.mxu1 %v2610_v14  ;;  %1973 = vmatprep.subr.bf16.mxu0 %v2613_v15  ;;  %v2689_v14 = vld [vmem:[#allocation6 + $0x460] ss:$24 sps:$4 sm:$0xff]   ;;  %v2694_v15 = vld [vmem:[#allocation6 + $0x134] ss:$24 sps:$4 sm:$0xff]  }
 0x1d3   :  { %1931 = vmatpush1.bf16.msra.mxu1 %v2608_v16  ;;  %1974 = vmatpush1.bf16.msra.mxu0 %v2611_v17  ;;  %v2697_v16 = vld [vmem:[#allocation6 + $0x434] ss:$24 sps:$4 sm:$0xff]   ;;  %v2692_v17 = vld [vmem:[#allocation6 + $0x130] ss:$24 sps:$4 sm:$0xff]  }
 0x1d4   :  { %1932 = vmatprep.subr.bf16.mxu1 %v2616_v18  ;;  %1975 = vmatprep.subr.bf16.mxu0 %v2619_v19  ;;  %v2695_v18 = vld [vmem:[#allocation6 + $0x430] ss:$24 sps:$4 sm:$0xff]   ;;  %v2700_v19 = vld [vmem:[#allocation6 + $0x104] ss:$24 sps:$4 sm:$0xff]  }
 0x1d7   :  { %1933 = vmatpush1.bf16.msra.mxu1 %v2614_v20  ;;  %1976 = vmatpush1.bf16.msra.mxu0 %v2617_v21  ;;  %v2703_v20 = vld [vmem:[#allocation6 + $0x404] ss:$24 sps:$4 sm:$0xff]   ;;  %v2698_v21 = vld [vmem:[#allocation6 + $0x100] ss:$24 sps:$4 sm:$0xff]  }
 0x1d8   :  { %1934 = vmatprep.subr.bf16.mxu1 %v2622_v22  ;;  %1977 = vmatprep.subr.bf16.mxu0 %v2625_v23  ;;  %v2701_v22 = vld [vmem:[#allocation6 + $0x400] ss:$24 sps:$4 sm:$0xff]   ;;  %v2706_v23 = vld [vmem:[#allocation6 + $0xd4] ss:$24 sps:$4 sm:$0xff]  }
 0x1db   :  { %1935 = vmatpush1.bf16.msra.mxu1 %v2620_v24  ;;  %1978 = vmatpush1.bf16.msra.mxu0 %v2623_v25  ;;  %v2709_v24 = vld [vmem:[#allocation6 + $0x3d4] ss:$24 sps:$4 sm:$0xff]   ;;  %v2704_v25 = vld [vmem:[#allocation6 + $0xd0] ss:$24 sps:$4 sm:$0xff]  }
 0x1dc   :  { %1936 = vmatprep.subr.bf16.mxu1 %v2628_v26  ;;  %1979 = vmatprep.subr.bf16.mxu0 %v2631_v27  ;;  %v2712_v26 = vld [vmem:[#allocation6 + $0xa4] ss:$24 sps:$4 sm:$0xff]   ;;  %v2710_v27 = vld [vmem:[#allocation6 + $0xa0] ss:$24 sps:$4 sm:$0xff]  }
 0x1df   :  { %1937 = vmatpush1.bf16.msra.mxu1 %v2626_v28  ;;  %1980 = vmatpush1.bf16.msra.mxu0 %v2629_v29  ;;  %v2713_v28 = vld [vmem:[#allocation6 + $0x3a0] ss:$24 sps:$4 sm:$0xff]   ;;  %v2718_v29 = vld [vmem:[#allocation6 + $0x74] ss:$24 sps:$4 sm:$0xff]  }
 0x1e0   :  { %1938 = vmatprep.subr.bf16.mxu1 %v2634_v32  ;;  %1981 = vmatprep.subr.bf16.mxu0 %v2637_v33  ;;  %v2721_v32 = vld [vmem:[#allocation6 + $0x374] ss:$24 sps:$4 sm:$0xff]   ;;  %v2716_v33 = vld [vmem:[#allocation6 + $0x70] ss:$24 sps:$4 sm:$0xff]  }
 0x1e3   :  { %1939 = vmatpush1.bf16.msra.mxu1 %v2632_v34  ;;  %1982 = vmatpush1.bf16.msra.mxu0 %v2635_v35  ;;  %v2719_v34 = vld [vmem:[#allocation6 + $0x370] ss:$24 sps:$4 sm:$0xff]   ;;  %v2724_v35 = vld [vmem:[#allocation6 + $0x44] ss:$24 sps:$4 sm:$0xff]  }
 0x1e4   :  { %1940 = vmatprep.subr.bf16.mxu1 %v2640_v36  ;;  %1983 = vmatprep.subr.bf16.mxu0 %v2643_v37  ;;  %v2727_v36 = vld [vmem:[#allocation6 + $0x344] ss:$24 sps:$4 sm:$0xff]   ;;  %v2722_v37 = vld [vmem:[#allocation6 + $0x40] ss:$24 sps:$4 sm:$0xff]  }
 0x1e7   :  { %1941 = vmatpush2.bf16.msra.mxu1 %v2638_v38  ;;  %1984 = vmatpush2.bf16.msra.mxu0 %v2641_v39  ;;  %v2725_v38 = vld [vmem:[#allocation6 + $0x340] ss:$24 sps:$4 sm:$0xff]   ;;  %v2730_v39 = vld [vmem:[#allocation6 + $0x14] ss:$24 sps:$4 sm:$0xff]  }
 0x1e8   :  { %1942 = vmatprep.subr.bf16.mxu1 %v2646_v40  ;;  %1985 = vmatprep.subr.bf16.mxu0 %v2649_v41  ;;  %v2733_v40 = vld [vmem:[#allocation6 + $0x314] ss:$24 sps:$4 sm:$0xff]   ;;  %v2728_v41 = vld [vmem:[#allocation6 + $0x10] ss:$24 sps:$4 sm:$0xff]  }
 0x1eb   :  { %1943 = vmatpush2.bf16.msra.mxu1 %v2644_v42  ;;  %1986 = vmatpush2.bf16.msra.mxu0 %v2647_v43  ;;  %v2731_v42 = vld [vmem:[#allocation6 + $0x310] ss:$24 sps:$4 sm:$0xff]   ;;  %v2736_v43 = vld [vmem:[#allocation6 + $0x2e4] ss:$24 sps:$4 sm:$0xff]  }
 0x1ec   :  { %1944 = vmatprep.subr.bf16.mxu1 %v2652_v44  ;;  %1987 = vmatprep.subr.bf16.mxu0 %v2655_v45  ;;  %v2739_v44 = vld [vmem:[#allocation6 + $0x5e4] ss:$24 sps:$4 sm:$0xff]   ;;  %v2734_v45 = vld [vmem:[#allocation6 + $0x2e0] ss:$24 sps:$4 sm:$0xff]  }
 0x1ef   :  { %1945 = vmatpush2.bf16.msra.mxu1 %v2650_v46  ;;  %1988 = vmatpush2.bf16.msra.mxu0 %v2653_v47  ;;  %v2737_v46 = vld [vmem:[#allocation6 + $0x5e0] ss:$24 sps:$4 sm:$0xff]   ;;  %v2742_v47 = vld [vmem:[#allocation6 + $0x2b4] ss:$24 sps:$4 sm:$0xff]  }
 0x1f0   :  { %1946 = vmatprep.subr.bf16.mxu1 %v2658_v48  ;;  %1989 = vmatprep.subr.bf16.mxu0 %v2661_v49  ;;  %v2745_v48 = vld [vmem:[#allocation6 + $0x5b4] ss:$24 sps:$4 sm:$0xff]   ;;  %v2740_v49 = vld [vmem:[#allocation6 + $0x2b0] ss:$24 sps:$4 sm:$0xff]  }
 0x1f3   :  { %1947 = vmatpush2.bf16.msra.mxu1 %v2656_v50  ;;  %1990 = vmatpush2.bf16.msra.mxu0 %v2659_v51  ;;  %v2743_v50 = vld [vmem:[#allocation6 + $0x5b0] ss:$24 sps:$4 sm:$0xff]   ;;  %v2748_v51 = vld [vmem:[#allocation6 + $0x284] ss:$24 sps:$4 sm:$0xff]  }
 0x1f4   :  { %1948 = vmatprep.subr.bf16.mxu1 %v2664_v52  ;;  %1991 = vmatprep.subr.bf16.mxu0 %v2667_v53  ;;  %v2751_v52 = vld [vmem:[#allocation6 + $0x584] ss:$24 sps:$4 sm:$0xff]   ;;  %v2746_v53 = vld [vmem:[#allocation6 + $0x280] ss:$24 sps:$4 sm:$0xff]  }
 0x1f7   :  { %1949 = vmatpush2.bf16.msra.mxu1 %v2662_v54  ;;  %1992 = vmatpush2.bf16.msra.mxu0 %v2665_v55  ;;  %v2749_v54 = vld [vmem:[#allocation6 + $0x580] ss:$24 sps:$4 sm:$0xff]   ;;  %v2754_v55 = vld [vmem:[#allocation6 + $0x254] ss:$24 sps:$4 sm:$0xff]  }
 0x1f8   :  { %1950 = vmatprep.subr.bf16.mxu1 %v2670_v56  ;;  %1993 = vmatprep.subr.bf16.mxu0 %v2673_v57  ;;  %v2757_v56 = vld [vmem:[#allocation6 + $0x554] ss:$24 sps:$4 sm:$0xff]   ;;  %v2752_v57 = vld [vmem:[#allocation6 + $0x250] ss:$24 sps:$4 sm:$0xff]  }
 0x1fb   :  { %1951 = vmatpush2.bf16.msra.mxu1 %v2668_v58  ;;  %1994 = vmatpush2.bf16.msra.mxu0 %v2671_v59  ;;  %v2755_v58 = vld [vmem:[#allocation6 + $0x550] ss:$24 sps:$4 sm:$0xff]   ;;  %v2760_v59 = vld [vmem:[#allocation6 + $0x224] ss:$24 sps:$4 sm:$0xff]  }
 0x1fc   :  { %1952 = vmatprep.subr.bf16.mxu1 %v2676_v60  ;;  %1995 = vmatprep.subr.bf16.mxu0 %v2679_v63  ;;  %v2763_v60 = vld [vmem:[#allocation6 + $0x524] ss:$24 sps:$4 sm:$0xff]   ;;  %v2758_v63 = vld [vmem:[#allocation6 + $0x220] ss:$24 sps:$4 sm:$0xff]  }
 0x1ff   :  { %1953 = vmatpush2.bf16.msra.mxu1 %v2674_v0  ;;  %1996 = vmatpush2.bf16.msra.mxu0 %v2677_v3  ;;  %v2761_v0 = vld [vmem:[#allocation6 + $0x520] ss:$24 sps:$4 sm:$0xff]   ;;  %v2766_v3 = vld [vmem:[#allocation6 + $0x1f4] ss:$24 sps:$4 sm:$0xff]  }
 0x200   :  { %1954 = vmatprep.subr.bf16.mxu1 %v2682_v4  ;;  %1997 = vmatprep.subr.bf16.mxu0 %v2685_v5  ;;  %v2769_v4 = vld [vmem:[#allocation6 + $0x4f4] ss:$24 sps:$4 sm:$0xff]   ;;  %v2764_v5 = vld [vmem:[#allocation6 + $0x1f0] ss:$24 sps:$4 sm:$0xff]  }
 0x203   :  { %1955 = vmatpush2.bf16.msra.mxu1 %v2680_v6  ;;  %1998 = vmatpush2.bf16.msra.mxu0 %v2683_v10  ;;  %v2767_v6 = vld [vmem:[#allocation6 + $0x4f0] ss:$24 sps:$4 sm:$0xff]   ;;  %v2772_v10 = vld [vmem:[#allocation6 + $0x1c4] ss:$24 sps:$4 sm:$0xff]  }
 0x204   :  { %2010 = vmatprep.subr.bf16.mxu1 %v2688_v11  ;;  %2053 = vmatprep.subr.bf16.mxu0 %v2691_v12  ;;  %v2775_v11 = vld [vmem:[#allocation6 + $0x4c4] ss:$24 sps:$4 sm:$0xff]   ;;  %v2770_v12 = vld [vmem:[#allocation6 + $0x1c0] ss:$24 sps:$4 sm:$0xff]  }
 0x206   :  { %1957 = vmatmul.mubr.bf16.vlgmr.msra.gmra.mxu1 %v2961_v1  ;;  %2000 = vmatmul.mubr.bf16.vlgmr.msra.gmra.mxu0 %v2963_v2 }
 0x207   :  { %2011 = vmatpush1.bf16.msra.mxu1 %v2686_v13  ;;  %2042 = vmatprep.mubr.bf16.mxu1 %v2957_v61  ;;  %v2707_v61 = vld [vmem:[#allocation6 + $0x3d0] ss:$24 sps:$4 sm:$0xff]   ;;  %v2773_v13 = vld [vmem:[#allocation6 + $0x4c0] ss:$24 sps:$4 sm:$0xff]  }
 0x208   :  { %2054 = vmatpush1.bf16.msra.mxu0 %v2689_v14  ;;  %2085 = vmatprep.mubr.bf16.mxu0 %v2959_v62  ;;  %v2715_v62 = vld [vmem:[#allocation6 + $0x3a4] ss:$24 sps:$4 sm:$0xff]   ;;  %v2778_v14 = vld [vmem:[#allocation6 + $0x194] ss:$24 sps:$4 sm:$0xff]  }
 0x209   :  { %2012 = vmatprep.subr.bf16.mxu1 %v2694_v15  ;;  %2055 = vmatprep.subr.bf16.mxu0 %v2697_v16  ;;  %v2781_v15 = vld [vmem:[#allocation6 + $0x494] ss:$24 sps:$4 sm:$0xff]   ;;  %v2776_v16 = vld [vmem:[#allocation6 + $0x190] ss:$24 sps:$4 sm:$0xff]  }
 0x20b   :  { %2013 = vmatpush1.bf16.msra.mxu1 %v2692_v17  ;;  %v2779_v17 = vld [vmem:[#allocation6 + $0x490] ss:$24 sps:$4 sm:$0xff]  }
 0x20c   :  { %2056 = vmatpush1.bf16.msra.mxu0 %v2695_v18  ;;  %2014 = vmatprep.subr.bf16.mxu1 %v2700_v19  ;;  %v2980_v18 = vld [vmem:[%s3038_s6] sm:$0x3f] }
 0x20d   :  { %2057 = vmatprep.subr.bf16.mxu0 %v2703_v20  ;;  %v851_v19 = vrot.slane %v2980_v18, %v2942_v9  ;;  %v855_v20 = vrot.slane %v2980_v18, %v2939_v8 }
 0x20f   :  { %2015 = vmatpush1.bf16.msra.mxu1 %v2698_v21 }
 0x210   :  { %2058 = vmatpush1.bf16.msra.mxu0 %v2701_v22  ;;  %2016 = vmatprep.subr.bf16.mxu1 %v2706_v23 }
 0x211   :  { %2059 = vmatprep.subr.bf16.mxu0 %v2709_v24 }
 0x213   :  { %2017 = vmatpush1.bf16.msra.mxu1 %v2704_v25 }
 0x214   :  { %2060 = vmatpush1.bf16.msra.mxu0 %v2707_v61  ;;  %2018 = vmatprep.subr.bf16.mxu1 %v2712_v26 }
 0x215   :  { %2061 = vmatprep.subr.bf16.mxu0 %v2715_v62 }
 0x217   :  { %2019 = vmatpush1.bf16.msra.mxu1 %v2710_v27 }
 0x218   :  { %2062 = vmatpush1.bf16.msra.mxu0 %v2713_v28  ;;  %2020 = vmatprep.subr.bf16.mxu1 %v2718_v29 }
 0x219   :  { %2063 = vmatprep.subr.bf16.mxu0 %v2721_v32 }
 0x21b   :  { %2021 = vmatpush1.bf16.msra.mxu1 %v2716_v33 }
 0x21c   :  { %2064 = vmatpush1.bf16.msra.mxu0 %v2719_v34  ;;  %2022 = vmatprep.subr.bf16.mxu1 %v2724_v35 }
 0x21d   :  { %2065 = vmatprep.subr.bf16.mxu0 %v2727_v36 }
 0x21f   :  { %2023 = vmatpush1.bf16.msra.mxu1 %v2722_v37  ;;  %v859_v37 = vrot.slane %v2980_v18, %v226_v31 }
 0x220   :  { %2066 = vmatpush1.bf16.msra.mxu0 %v2725_v38  ;;  %2024 = vmatprep.subr.bf16.mxu1 %v2730_v39  ;;  %v863_v38 = vrot.slane %v2980_v18, %v230_v30 }
 0x221   :  { %2067 = vmatprep.subr.bf16.mxu0 %v2733_v40 }
 0x223   :  { %2025 = vmatpush1.bf16.msra.mxu1 %v2728_v41 }
 0x224   :  { %2068 = vmatpush1.bf16.msra.mxu0 %v2731_v42  ;;  %2026 = vmatprep.subr.bf16.mxu1 %v2736_v43 }
 0x225   :  { %2069 = vmatprep.subr.bf16.mxu0 %v2739_v44 }
 0x227   :  { %2027 = vmatpush2.bf16.msra.mxu1 %v2734_v45 }
 0x228   :  { %2070 = vmatpush2.bf16.msra.mxu0 %v2737_v46  ;;  %2028 = vmatprep.subr.bf16.mxu1 %v2742_v47 }
 0x229   :  { %2071 = vmatprep.subr.bf16.mxu0 %v2745_v48 }
 0x22b   :  { %2029 = vmatpush2.bf16.msra.mxu1 %v2740_v49 }
 0x22c   :  { %2072 = vmatpush2.bf16.msra.mxu0 %v2743_v50  ;;  %2030 = vmatprep.subr.bf16.mxu1 %v2748_v51 }
 0x22d   :  { %2073 = vmatprep.subr.bf16.mxu0 %v2751_v52 }
 0x22f   :  { %2031 = vmatpush2.bf16.msra.mxu1 %v2746_v53 }
 0x230   :  { %2074 = vmatpush2.bf16.msra.mxu0 %v2749_v54  ;;  %2032 = vmatprep.subr.bf16.mxu1 %v2754_v55 }
 0x231   :  { %2075 = vmatprep.subr.bf16.mxu0 %v2757_v56 }
 0x233   :  { %2033 = vmatpush2.bf16.msra.mxu1 %v2752_v57  ;;  %v866_v57 = vsub.s32 4, %v2936_v7 }
 0x234   :  { %2076 = vmatpush2.bf16.msra.mxu0 %v2755_v58  ;;  %2034 = vmatprep.subr.bf16.mxu1 %v2760_v59  ;;  %v870_v58 = vsub.s32 5, %v2936_v7 }
 0x235   :  { %2077 = vmatprep.subr.bf16.mxu0 %v2763_v60  ;;  %v867_v59 = vrot.slane %v2980_v18, %v866_v57 }
 0x236   :  { %v871_v60 = vrot.slane %v2980_v18, %v870_v58 }
 0x237   :  { %2035 = vmatpush2.bf16.msra.mxu1 %v2758_v63 }
 0x238   :  { %2078 = vmatpush2.bf16.msra.mxu0 %v2761_v0  ;;  %2036 = vmatprep.subr.bf16.mxu1 %v2766_v3 }
 0x239   :  { %2079 = vmatprep.subr.bf16.mxu0 %v2769_v4 }
 0x23b   :  { %2037 = vmatpush2.bf16.msra.mxu1 %v2764_v5 }
 0x23c   :  { %2080 = vmatpush2.bf16.msra.mxu0 %v2767_v6  ;;  %2038 = vmatprep.subr.bf16.mxu1 %v2772_v10 }
 0x23d   :  { %2081 = vmatprep.subr.bf16.mxu0 %v2775_v11 }
 0x23f   :  { %2039 = vmatpush2.bf16.msra.mxu1 %v2770_v12 }
 0x240   :  { %2082 = vmatpush2.bf16.msra.mxu0 %v2773_v13  ;;  %2040 = vmatprep.subr.bf16.mxu1 %v2778_v14 }
 0x241   :  { %2083 = vmatprep.subr.bf16.mxu0 %v2781_v15 }
 0x243   :  { %2041 = vmatpush2.bf16.msra.mxu1 %v2776_v16 }
 0x244   :  { %2084 = vmatpush2.bf16.msra.mxu0 %v2779_v17 }
 0x246   :  { %2043 = vmatmul.mubr.bf16.vlgmr.msra.gmra.mxu1 %v2961_v1 }
 0x247   :  { %2086 = vmatmul.mubr.bf16.vlgmr.msra.gmra.mxu0 %v2963_v2 }
 0x286   :  { %v1872_v21 = vpop.f32.mrf.mxu1  ;;  %v1915_v22 = vpop.f32.mrf.mxu0 }
 0x287   :  { %v1873_v23 = vadd.f32 %v1872_v21, %v851_v19 }
 0x288   :  { %v1874_v24 = vpop.f32.mrf.mxu1  ;;  %v1917_v25 = vpop.f32.mrf.mxu0 }
 0x289   :  { %v1916_v61 = vadd.f32 %v1915_v22, %v1873_v23  ;;  %v1875_v1 = vadd.f32 %v1874_v24, %v855_v20 }
 0x28a   :  { %v1876_v26 = vpop.f32.mrf.mxu1  ;;  %v1919_v2 = vpop.f32.mrf.mxu0 }
 0x28b   :  { %2782 = vtanh.f32 %v1916_v61  ;;  %v1918_v62 = vadd.f32 %v1917_v25, %v1875_v1  ;;  %v1877_v27 = vadd.f32 %v1876_v26, %v851_v19 }
 0x28c   :  { %v1878_v28 = vpop.f32.mrf.mxu1  ;;  %v1921_v9 = vpop.f32.mrf.mxu0 }
 0x28d   :  { %2784 = vtanh.f32 %v1918_v62  ;;  %v1920_v29 = vadd.f32 %v1919_v2, %v1877_v27  ;;  %v1879_v32 = vadd.f32 %v1878_v28, %v855_v20 }
 0x28f   :  { %2786 = vtanh.f32 %v1920_v29  ;;  %v1922_v33 = vadd.f32 %v1921_v9, %v1879_v32 }
 0x291   :  { %2788 = vtanh.f32 %v1922_v33 }
 0x298   :  { %v2783_v8 = vpop.eup %2782 }
 0x299   :  { %2108 = vst [vmem:[%s3039_s7] sm:$0xff] %v2783_v8 }
 0x29a   :  { %v2785_v34 = vpop.eup %2784 }
 0x29b   :  { %2109 = vst [vmem:[%s3039_s7 + $0x8] sm:$0xff] %v2785_v34 }
 0x29c   :  { %v2787_v35 = vpop.eup %2786 }
 0x29d   :  { %2114 = vst [vmem:[%s3039_s7 + $0x30] sm:$0xff] %v2787_v35 }
 0x29e   :  { %v2789_v36 = vpop.eup %2788 }
 0x29f   :  { %2115 = vst [vmem:[%s3039_s7 + $0x38] sm:$0xff] %v2789_v36 }
 0x2c6   :  { %v1958_v39 = vpop.f32.mrf.mxu1  ;;  %v2001_v40 = vpop.f32.mrf.mxu0 }
 0x2c7   :  { %v1959_v41 = vadd.f32 %v1958_v39, %v859_v37 }
 0x2c8   :  { %v1960_v42 = vpop.f32.mrf.mxu1  ;;  %v2003_v43 = vpop.f32.mrf.mxu0 }
 0x2c9   :  { %v2002_v44 = vadd.f32 %v2001_v40, %v1959_v41  ;;  %v1961_v45 = vadd.f32 %v1960_v42, %v863_v38 }
 0x2ca   :  { %v1962_v46 = vpop.f32.mrf.mxu1  ;;  %v2005_v47 = vpop.f32.mrf.mxu0 }
 0x2cb   :  { %2790 = vtanh.f32 %v2002_v44  ;;  %v2004_v48 = vadd.f32 %v2003_v43, %v1961_v45  ;;  %v1963_v49 = vadd.f32 %v1962_v46, %v859_v37 }
 0x2cc   :  { %v1964_v50 = vpop.f32.mrf.mxu1  ;;  %v2007_v52 = vpop.f32.mrf.mxu0 }
 0x2cd   :  { %2792 = vtanh.f32 %v2004_v48  ;;  %v2006_v51 = vadd.f32 %v2005_v47, %v1963_v49  ;;  %v1965_v31 = vadd.f32 %v1964_v50, %v863_v38 }
 0x2cf   :  { %2794 = vtanh.f32 %v2006_v51  ;;  %v2008_v53 = vadd.f32 %v2007_v52, %v1965_v31 }
 0x2d1   :  { %2796 = vtanh.f32 %v2008_v53 }
 0x2d8   :  { %v2791_v30 = vpop.eup %2790 }
 0x2d9   :  { %2110 = vst [vmem:[%s3039_s7 + $0x10] sm:$0xff] %v2791_v30 }
 0x2da   :  { %v2793_v54 = vpop.eup %2792 }
 0x2db   :  { %2111 = vst [vmem:[%s3039_s7 + $0x18] sm:$0xff] %v2793_v54 }
 0x2dc   :  { %v2795_v55 = vpop.eup %2794 }
 0x2dd   :  { %2116 = vst [vmem:[%s3039_s7 + $0x40] sm:$0xff] %v2795_v55 }
 0x2de   :  { %v2797_v56 = vpop.eup %2796 }
 0x2df   :  { %2117 = vst [vmem:[%s3039_s7 + $0x48] sm:$0xff] %v2797_v56 }
 0x306   :  { %v2044_v63 = vpop.f32.mrf.mxu1 }
 0x307   :  { %v2045_v0 = vadd.f32 %v2044_v63, %v867_v59  ;;  %v2087_v3 = vpop.f32.mrf.mxu0 }
 0x308   :  { %v2046_v4 = vpop.f32.mrf.mxu1 }
 0x309   :  { %v2088_v5 = vadd.f32 %v2087_v3, %v2045_v0  ;;  %v2047_v6 = vadd.f32 %v2046_v4, %v871_v60  ;;  %v2089_v10 = vpop.f32.mrf.mxu0 }
 0x30a   :  { %v2048_v11 = vpop.f32.mrf.mxu1 }
 0x30b   :  { %2798 = vtanh.f32 %v2088_v5  ;;  %v2090_v12 = vadd.f32 %v2089_v10, %v2047_v6  ;;  %v2049_v13 = vadd.f32 %v2048_v11, %v867_v59  ;;  %v2091_v14 = vpop.f32.mrf.mxu0 }
 0x30c   :  { %v2050_v15 = vpop.f32.mrf.mxu1 }
 0x30d   :  { %2800 = vtanh.f32 %v2090_v12  ;;  %v2092_v16 = vadd.f32 %v2091_v14, %v2049_v13  ;;  %v2051_v7 = vadd.f32 %v2050_v15, %v871_v60  ;;  %v2093_v17 = vpop.f32.mrf.mxu0 }
 0x30f   :  { %2802 = vtanh.f32 %v2092_v16  ;;  %v2094_v19 = vadd.f32 %v2093_v17, %v2051_v7 }
 0x311   :  { %2804 = vtanh.f32 %v2094_v19 }
 0x318   :  { %v2799_v18 = vpop.eup %2798 }
 0x319   :  { %2112 = vst [vmem:[%s3039_s7 + $0x20] sm:$0xff] %v2799_v18 }
 0x31a   :  { %v2801_v20 = vpop.eup %2800 }
 0x31b   :  { %2113 = vst [vmem:[%s3039_s7 + $0x28] sm:$0xff] %v2801_v20 }
 0x31c   :  { %v2803_v21 = vpop.eup %2802 }
 0x31d   :  { %2118 = vst [vmem:[%s3039_s7 + $0x50] sm:$0xff] %v2803_v21 }
 0x31e   :  { %v2805_v22 = vpop.eup %2804 }
 0x31f   :  { %2119 = vst [vmem:[%s3039_s7 + $0x58] sm:$0xff] %v2805_v22 }
 0x320   :  { %2124 = vsyncpa [#allocation3], 1 }
 0x321   :  { %2125 = vsyncpa [#allocation5], 1 }

</bundles_post_ra>
